<compile_context>
chip_gen: v6e
topology: v6e:2x2x1
jax: 0.10.0
libtpu: 0.0.40
codegen_flags: <defaults>
</compile_context>

<pallas_src>
import jax
import jax.numpy as jnp
from jax.experimental import pallas as pl
from jax.experimental.pallas import tpu as pltpu


def _fused_gcn_kernel(a_ref, x_ref, w_ref, b_ref, o_ref):
    """One grid step: o[i] (+)= A[i,k] @ (X[k] @ W); bias+ReLU at k == last."""
    k = pl.program_id(1)

    # Recompute the XW K-tile on the fly: (tk, f_in) @ (f_in, f_out), f32 acc,
    # cast back to bf16 so the second matmul stays a bf16 MXU op.
    xw = jnp.dot(
        x_ref[...], w_ref[...], preferred_element_type=jnp.float32
    ).astype(jnp.bfloat16)

    # A_hat row-tile @ XW K-tile, f32 accumulation on the MXU.
    partial = jnp.dot(a_ref[...], xw, preferred_element_type=jnp.float32)

    @pl.when(k == 0)
    def _():
        o_ref[...] = jnp.zeros_like(o_ref)

    # Output block index is (i, 0) for every k -> resident; accumulate in place.
    o_ref[...] += partial

    @pl.when(k == pl.num_programs(1) - 1)
    def _():
        # Bias + ReLU once per output row tile (finalize), not per K step.
        o_ref[...] = jnp.maximum(o_ref[...] + b_ref[...], 0.0)


def graph_encoder_block(a_hat, x, w, b, *, tm=512, tk=512):
    """GraphEncoderBlock.forward: encoder(graph) node features.

    a_hat: [N, N] normalized adjacency, x: [N, F_in], w: [F_in, F_out],
    b: [1, F_out].  Returns f32 [N, F_out].
    """
    n, f_in = x.shape
    f_out = w.shape[1]
    tm = min(tm, n)
    tk = min(tk, n)
    assert n % tm == 0 and n % tk == 0, "node count must divide the tile sizes"

    a_bf = a_hat.astype(jnp.bfloat16)
    x_bf = x.astype(jnp.bfloat16)
    w_bf = w.astype(jnp.bfloat16)
    b_f32 = b.astype(jnp.float32).reshape(1, f_out)

    # VMEM footprint: double-buffered A / X / output tiles + resident W + bias.
    vmem_bytes = (
        2 * (tm * tk * 2)            # A_hat bf16 tiles (double-buffered)
        + 2 * (tk * f_in * 2)        # X bf16 K-tiles (double-buffered)
        + 2 * (tm * f_out * 4)       # f32 output tiles (double-buffered)
        + f_in * f_out * 2           # resident W (bf16)
        + f_out * 4                  # bias
    )
    vmem_limit = int(min(max(2 * vmem_bytes, 4 << 20), 96 << 20))

    n_row_tiles = n // tm
    flops = 2 * n * n * f_out + 2 * n_row_tiles * n * f_in * f_out
    bytes_accessed = (
        n * n * 2                    # A_hat stream (bf16)
        + n_row_tiles * n * f_in * 2  # X K-tiles re-read per row tile (bf16)
        + f_in * f_out * 2 + f_out * 4
        + n * f_out * 4              # f32 output writeback
    )

    out = pl.pallas_call(
        _fused_gcn_kernel,
        out_shape=jax.ShapeDtypeStruct((n, f_out), jnp.float32),
        grid_spec=pltpu.PrefetchScalarGridSpec(
            num_scalar_prefetch=0,
            grid=(n // tm, n // tk),
            in_specs=[
                pl.BlockSpec((tm, tk), lambda i, k: (i, k)),        # A_hat tile
                pl.BlockSpec((tk, f_in), lambda i, k: (k, 0)),      # X K-tile
                pl.BlockSpec((f_in, f_out), lambda i, k: (0, 0)),   # W resident
                pl.BlockSpec((1, f_out), lambda i, k: (0, 0)),      # bias resident
            ],
            out_specs=pl.BlockSpec((tm, f_out), lambda i, k: (i, 0)),
        ),
        compiler_params=pltpu.CompilerParams(
            dimension_semantics=("parallel", "arbitrary"),
            vmem_limit_bytes=vmem_limit,
        ),
        cost_estimate=pl.CostEstimate(
            flops=flops, transcendentals=0, bytes_accessed=bytes_accessed
        ),
    )(a_bf, x_bf, w_bf, b_f32)
    return out


def build_normalized_adjacency(edge_index, num_nodes):
    """Glue (plain JAX): dense A_hat = D^-1/2 (A + I) D^-1/2."""
    src, dst = edge_index
    adj = jnp.zeros((num_nodes, num_nodes), jnp.float32)
    adj = adj.at[src, dst].set(1.0)
    adj = jnp.maximum(adj, adj.T)                       # symmetrize
    adj = adj + jnp.eye(num_nodes, dtype=jnp.float32)   # self loops
    deg = adj.sum(axis=1)
    d_inv_sqrt = 1.0 / jnp.sqrt(jnp.maximum(deg, 1.0))
    return adj * d_inv_sqrt[:, None] * d_inv_sqrt[None, :]


def reference_forward(a_hat, x, w, b):
    """Plain-JAX reference using the same bf16-operand / f32-accumulate path."""
    xw = jnp.dot(
        x.astype(jnp.bfloat16), w.astype(jnp.bfloat16),
        preferred_element_type=jnp.float32,
    ).astype(jnp.bfloat16)
    axw = jnp.dot(
        a_hat.astype(jnp.bfloat16), xw, preferred_element_type=jnp.float32
    )
    return jnp.maximum(axw + b.astype(jnp.float32), 0.0)


if __name__ == "__main__":
    # Small-but-lane-dense synthetic graph: 512 nodes, 128 in / 128 out features.
    N, F_IN, F_OUT, N_EDGES = 512, 128, 128, 4096

    key = jax.random.PRNGKey(0)
    k_x, k_e, k_w, k_b = jax.random.split(key, 4)

    x = jax.random.normal(k_x, (N, F_IN), dtype=jnp.float32)
    edge_index = jax.random.randint(k_e, (2, N_EDGES), 0, N)
    a_hat = build_normalized_adjacency(edge_index, N)

    # Deterministic parameter init (Glorot-style scale).
    w = jax.random.normal(k_w, (F_IN, F_OUT), dtype=jnp.float32) * (
        1.0 / jnp.sqrt(jnp.float32(F_IN))
    )
    b = jax.random.normal(k_b, (1, F_OUT), dtype=jnp.float32) * 0.01

    # tm=256 -> two row tiles (one per TensorCore on megacore parts); the whole
    # N=512 problem is resident per step, so one K tile (tk=512) suffices.
    out = graph_encoder_block(a_hat, x, w, b, tm=256, tk=512)
    out = jax.block_until_ready(out)

    ref = reference_forward(a_hat, x, w, b)
    assert out.shape == (N, F_OUT)
    assert jnp.allclose(out, ref, atol=1e-2, rtol=1e-2), "mismatch vs reference"

    # TODO(synk): GraphEncoderBlock is a pure pass-through wrapper; the encoder
    # instance is injected at construction time, so a representative GCN layer
    # was chosen as the wrapped encoder.
    print("KERNEL_OK")
</pallas_src>

<mosaic_0001>
module attributes {stable_mosaic.version = 11 : i64} {
  func.func @_fused_gcn_kernel(%arg0: i32, %arg1: i32, %arg2: memref<256x512xbf16, #tpu.memory_space<vmem>>, %arg3: memref<512x128xbf16, #tpu.memory_space<vmem>>, %arg4: memref<128x128xbf16, #tpu.memory_space<vmem>>, %arg5: memref<1x128xf32, #tpu.memory_space<vmem>>, %arg6: memref<256x128xf32, #tpu.memory_space<vmem>>) attributes {dimension_semantics = [#tpu.dimension_semantics<parallel>, #tpu.dimension_semantics<arbitrary>], iteration_bounds = array<i64: 2, 1>, scalar_prefetch = 0 : i64, scratch_operands = 0 : i64, tpu.core_type = #tpu.core_type<tc>, window_params = [{transform_indices = @transform_0, window_bounds = array<i64: 256, 512>}, {transform_indices = @transform_1, window_bounds = array<i64: 512, 128>}, {pipeline_mode = #tpu.pipeline_mode<synchronous>, transform_indices = @transform_2, window_bounds = array<i64: 128, 128>}, {pipeline_mode = #tpu.pipeline_mode<synchronous>, transform_indices = @transform_3, window_bounds = array<i64: 1, 128>}, {transform_indices = @transform_4, window_bounds = array<i64: 256, 128>}]} {
    %c0 = arith.constant 0 : index
    %c0_0 = arith.constant 0 : index
    %0 = vector.load %arg3[%c0, %c0_0] : memref<512x128xbf16, #tpu.memory_space<vmem>>, vector<512x128xbf16>
    %c0_1 = arith.constant 0 : index
    %c0_2 = arith.constant 0 : index
    %1 = vector.load %arg4[%c0_1, %c0_2] : memref<128x128xbf16, #tpu.memory_space<vmem>>, vector<128x128xbf16>
    %cst = arith.constant dense<0.000000e+00> : vector<512x128xf32>
    %2 = tpu.matmul %0, %1, %cst {dimension_numbers = #tpu.dot_dimension_numbers<[1], [0], [0], [1], [0, 0, 1, 1], [], []>} : vector<512x128xbf16>, vector<128x128xbf16>, vector<512x128xf32> -> vector<512x128xf32>
    %3 = arith.truncf %2 : vector<512x128xf32> to vector<512x128xbf16>
    %c0_3 = arith.constant 0 : index
    %c0_4 = arith.constant 0 : index
    %4 = vector.load %arg2[%c0_3, %c0_4] : memref<256x512xbf16, #tpu.memory_space<vmem>>, vector<256x512xbf16>
    %cst_5 = arith.constant dense<0.000000e+00> : vector<256x128xf32>
    %5 = tpu.matmul %4, %3, %cst_5 {dimension_numbers = #tpu.dot_dimension_numbers<[1], [0], [0], [1], [0, 0, 1, 1], [], []>} : vector<256x512xbf16>, vector<512x128xbf16>, vector<256x128xf32> -> vector<256x128xf32>
    %c0_i32 = arith.constant 0 : i32
    %6 = arith.cmpi eq, %arg1, %c0_i32 : i32
    %7 = arith.extui %6 : i1 to i32
    %c0_i32_6 = arith.constant 0 : i32
    %8 = arith.cmpi ne, %7, %c0_i32_6 : i32
    scf.if %8 {
      %cst_13 = arith.constant 0.000000e+00 : f32
      %15 = vector.broadcast %cst_13 : f32 to vector<256x128xf32>
      %c0_14 = arith.constant 0 : index
      %c0_15 = arith.constant 0 : index
      %16 = vector.load %arg6[%c0_14, %c0_15] : memref<256x128xf32, #tpu.memory_space<vmem>>, vector<256x128xf32>
      tpu.vector_store %arg6[%c0_14, %c0_15], %15 {strides = array<i32>} : memref<256x128xf32, #tpu.memory_space<vmem>>, vector<256x128xf32>,
    } else {
    }
    %c0_7 = arith.constant 0 : index
    %c0_8 = arith.constant 0 : index
    %9 = vector.load %arg6[%c0_7, %c0_8] : memref<256x128xf32, #tpu.memory_space<vmem>>, vector<256x128xf32>
    %10 = arith.addf %9, %5 : vector<256x128xf32>
    %c0_9 = arith.constant 0 : index
    %c0_10 = arith.constant 0 : index
    %11 = vector.load %arg6[%c0_9, %c0_10] : memref<256x128xf32, #tpu.memory_space<vmem>>, vector<256x128xf32>
    tpu.vector_store %arg6[%c0_9, %c0_10], %10 {strides = array<i32>} : memref<256x128xf32, #tpu.memory_space<vmem>>, vector<256x128xf32>,
    %c0_i32_11 = arith.constant 0 : i32
    %12 = arith.cmpi eq, %arg1, %c0_i32_11 : i32
    %13 = arith.extui %12 : i1 to i32
    %c0_i32_12 = arith.constant 0 : i32
    %14 = arith.cmpi ne, %13, %c0_i32_12 : i32
    scf.if %14 {
      %c0_13 = arith.constant 0 : index
      %c0_14 = arith.constant 0 : index
      %15 = vector.load %arg6[%c0_13, %c0_14] : memref<256x128xf32, #tpu.memory_space<vmem>>, vector<256x128xf32>
      %c0_15 = arith.constant 0 : index
      %c0_16 = arith.constant 0 : index
      %16 = vector.load %arg5[%c0_15, %c0_16] : memref<1x128xf32, #tpu.memory_space<vmem>>, vector<1x128xf32>
      %17 = vector.broadcast %16 : vector<1x128xf32> to vector<256x128xf32>
      %18 = arith.addf %15, %17 : vector<256x128xf32>
      %cst_17 = arith.constant 0.000000e+00 : f32
      %19 = vector.broadcast %cst_17 : f32 to vector<256x128xf32>
      %20 = arith.maximumf %18, %19 : vector<256x128xf32>
      %c0_18 = arith.constant 0 : index
      %c0_19 = arith.constant 0 : index
      %21 = vector.load %arg6[%c0_18, %c0_19] : memref<256x128xf32, #tpu.memory_space<vmem>>, vector<256x128xf32>
      tpu.vector_store %arg6[%c0_18, %c0_19], %20 {strides = array<i32>} : memref<256x128xf32, #tpu.memory_space<vmem>>, vector<256x128xf32>,
    } else {
    }
    return
  }
  func.func @transform_0(%arg0: i32, %arg1: i32) -> (i32, i32) {
    %c0_i32 = arith.constant 0 : i32
    return %arg0, %arg1 : i32, i32
  }
  func.func @transform_1(%arg0: i32, %arg1: i32) -> (i32, i32) {
    %c0_i32 = arith.constant 0 : i32
    %c0_i32_0 = arith.constant 0 : i32
    return %arg1, %c0_i32 : i32, i32
  }
  func.func @transform_2(%arg0: i32, %arg1: i32) -> (i32, i32) {
    %c0_i32 = arith.constant 0 : i32
    %c0_i32_0 = arith.constant 0 : i32
    %c0_i32_1 = arith.constant 0 : i32
    return %c0_i32, %c0_i32_0 : i32, i32
  }
  func.func @transform_3(%arg0: i32, %arg1: i32) -> (i32, i32) {
    %c0_i32 = arith.constant 0 : i32
    %c0_i32_0 = arith.constant 0 : i32
    %c0_i32_1 = arith.constant 0 : i32
    return %c0_i32, %c0_i32_0 : i32, i32
  }
  func.func @transform_4(%arg0: i32, %arg1: i32) -> (i32, i32) {
    %c0_i32 = arith.constant 0 : i32
    %c0_i32_0 = arith.constant 0 : i32
    return %arg0, %c0_i32 : i32, i32
  }
}

</mosaic_0001>

<bundles_post_ra>
// kernel: tpu_custom_call.1
= control target key start
LH: loop header
LB: loop body
LE: loop exit
PB: predicated region body
PF: predicated region fallthrough
CT: control target
= control target key end

     0   :  { %9 = vsyncpa [#allocation3], 0  ;;  %s3373_s0 = inlined_call_operand.hbm [shape: bf16[512,512], index: 0, kind: input, shape index: {}]   ;;  %s3374_s1 = inlined_call_operand.hbm [shape: bf16[512,128], index: 1, kind: input, shape index: {}]   ;;  %s3375_s2 = inlined_call_operand.hbm [shape: bf16[128,128], index: 2, kind: input, shape index: {}]   ;;  %s3376_s3 = inlined_call_operand.vmem [shape: f32[1,128], index: 3, kind: input, shape index: {}]   ;;  %s3377_s4 = inlined_call_operand.hbm [shape: f32[512,128], index: 4, kind: output, shape index: {}]  }
   0x1   :  { %11 = vsyncpa [#allocation3 + $0x1], 0 }
   0x2   :  { %12 = vsyncpa [#allocation6], 0 }
   0x3   :  { %13 = vsyncpa [#allocation4], 0 }
   0x4   :  { %15 = vsyncpa [#allocation4 + $0x1], 0  ;;  %s2926_s15 = smov 0   ;;  %s2928_s16 = smov 0  }
   0x5   :  { %s2930_s17 = smov 0   ;;  %s2932_s18 = smov 0  }
   0x6   :  { %s2934_s19 = smov 0   ;;  %s2936_s20 = smov 0  }
   0x7 LB: > { %s2011_s21 = sadd.s32 4294967295, %s2889_s20   ;;  %s2012_s22 = sadd.s32 4294967294, %s2889_s20   ;;  %s2889_s20 = sphi %s2936_s20, %s21_s20   ;;  %s2885_s19 = sphi %s2934_s19, %s3433_s19   ;;  %s2881_s18 = sphi %s2932_s18, %s3432_s18   ;;  %s2877_s17 = sphi %s2930_s17, %s3431_s17   ;;  %s2873_s16 = sphi %s2928_s16, %s3430_s16   ;;  %s2869_s15 = sphi %s2926_s15, %s3429_s15  }
   0x8   : > { %p55_p0 = scmp.ne.s32.totalorder %s2873_s16, %s2869_s15  ;;  %p2960_p1 = scmp.eq.s32.totalorder %s2011_s21, 0 }
   0x9   : > { %p2964_p2 = scmp.eq.s32.totalorder %s2011_s21, 1  ;;  %p153_p3 = scmp.eq.s32.totalorder %s2012_s22, 1 }
   0xa   : > { %s3389_s23 = scalar_select %p2960_p1, 1, 0 }
   0xb   : > { %p2970_p4 = por %p2960_p1, %p55_p0  ;;  %p2013_p5 = scmp.ge.s32.totalorder %s2889_s20, 1 }
   0xc   : > { %p2975_p6 = por %p153_p3, %p55_p0  ;;  %p160_p7 = scmp.lt.s32.totalorder %s2889_s20, 3 }
   0xd   : > { %s3391_s25 = scalar_select %p2970_p4, 1, 0 }
   0xe   : > { %s3392_s26 = scalar_select %p2975_p6, 1, 0 }
   0xf   : > { %p2980_p8 = pnand %p2013_p5, %p160_p7  ;;  %s2891_s28 = smov [#allocation5]  }
  0x10   : > { %s175_s29 = sshll.u32 %s2891_s28, 4  ;;  %s2892_s5 = smov [#allocation7]   ;;  %s176_s29 = int_to_ptr.vmem [resolvable:$true] %s175_s29 }
  0x11   : > { %p2511_p9 = pneg %p2980_p8  ;;  %s188_s6 = sshll.u32 %s2892_s5, 4  ;;  %s189_s6 = int_to_ptr.vmem [resolvable:$true] %s188_s6 }
  0x12   : > { %s2736_s7 = scalar_lea.vmem %s176_s29, 4096  ;;  %p2744_p5 = scmp.lt.s32.totalorder %s176_s29, %s176_s29 }
  0x13   : > { %p2989_p11 = pnand %p2511_p9, %p2960_p1  ;;  %p2737_p13 = scmp.ne.s32.totalorder %s176_s29, %s2736_s7 }
  0x14   : > { %p2745_p7 = scmp.lt.s32.totalorder %s2736_s7, %s2736_s7 }
  0x15   : > { %p2727_p12 = pneg %p2989_p11 }
  0x16   : > { %p2746_p10 = por %p2745_p7, %p2744_p5 }
  0x17   : > { %p2739_p0 = pnand %p2737_p13, %p2727_p12 }
  0x19   : > { %p2740_p3 = pneg %p2739_p0 }
  0x1b   : > { %p2747_p9 = pnand %p2746_p10, %p2740_p3 }
  0x1d   : > { %2750 = shalt.err (!%p2747_p9)
}
  0x1e   : > { %s2893_s8 = smov 64   ;;  %s2894_s9 = smov 4  }
  0x1f   : > { %2514 = dma.hbm_to_vmem [thread:$0]  (!%p2989_p11), %s3374_s1, 4096, %s176_s29, [#allocation6], %s2893_s8, %s2893_s8, %s2894_s9  }
  0x20   : > { %s2762_s12 = scalar_lea.vmem %s189_s6, 1024  ;;  %p2770_p1 = scmp.lt.s32.totalorder %s189_s6, %s189_s6 }
  0x21   : > { %p2763_p6 = scmp.ne.s32.totalorder %s189_s6, %s2762_s12  ;;  %p2771_p4 = scmp.lt.s32.totalorder %s2762_s12, %s2762_s12 }
  0x23   : > { %p2765_p13 = pnand %p2763_p6, %p2727_p12  ;;  %p2772_p5 = por %p2771_p4, %p2770_p1 }
  0x25   : > { %p2766_p0 = pneg %p2765_p13 }
  0x27   : > { %p2773_p10 = pnand %p2772_p5, %p2766_p0 }
  0x29   : > { %2776 = shalt.err (!%p2773_p10)
}
  0x2a   : > { %2517 = dma.hbm_to_vmem [thread:$0]  (!%p2989_p11), %s3375_s2, 1024, %s189_s6, [#allocation6], %s2893_s8, %s2893_s8, %s2894_s9  }
  0x2b   : > { %s33_s21 = sadd.s32 1, %s2885_s19  ;;  %s42_s22 = sadd.s32 1, %s2877_s17 }
  0x2c   : > { %p35_p1 = scmp.ge.s32.totalorder %s33_s21, 2  ;;  %p49_p4 = scmp.ne.s32.totalorder %s2877_s17, %s2873_s16 }
  0x2d   : > { %p50_p6 = scmp.eq.s32.totalorder %s2889_s20, 0  ;;  %p2528_p12 = scmp.lt.s32.totalorder %s2889_s20, 2 }
  0x2e   : > { %s3435_s21 = smov (%p35_p1, %s33_s21), 0  ;;  %p3021_p7 = por %p2964_p2, %p49_p4 }
  0x2f   : > { %p51_p3 = por %p50_p6, %p49_p4  ;;  %s37_s29 = ssub.s32 %s2885_s19, %s3435_s21 }
  0x30   : > { %s205_s30 = sand.u32 1, %s2877_s17   ;;  %p40_p9 = scmp.eq.s32.totalorder %s37_s29, 0 }
  0x31   : > { %s2017_s5 = sshll.u32 %s205_s30, 9  ;;  %s2137_s6 = sshll.u32 %s2885_s19, 13 }
  0x32   : > { %s3030_s7 = scalar_select %p40_p9, %s2877_s17, %s42_s22  }
  0x33   : > { %s218_s10 = scalar_lea.hbm %s3373_s0, %s2137_s6  ;;  %s209_s11 = scalar_lea.vmem [#allocation2], %s2017_s5 }
  0x34   : > { %s219_s12 = sshll.u32 %s209_s11, 4  ;;  %p3037_p11 = pnand %p2528_p12, %p51_p3  ;;  %s220_s12 = int_to_ptr.vmem [resolvable:$true] %s219_s12 }
  0x35   : > { %s206_s13 = scalar_lea.sflag [#allocation3], %s205_s30  ;;  %s2790_s14 = scalar_lea.vmem %s220_s12, 8192 }
  0x36   : > { %p2779_p2 = pneg %p3037_p11  ;;  %p2791_p13 = scmp.ne.s32.totalorder %s220_s12, %s2790_s14 }
  0x37   : > { %s2895_s22 = smov [#allocation2]  }
  0x38   : > { %p2793_p0 = pnand %p2791_p13, %p2779_p2  ;;  %s2795_s29 = sshll.u32 %s2895_s22, 4  ;;  %s2796_s29 = int_to_ptr.vmem [resolvable:$false] %s2795_s29 }
  0x39   : > { %s2797_s6 = scalar_lea.vmem %s2796_s29, 16384  ;;  %p2798_p10 = scmp.lt.s32.totalorder %s220_s12, %s2796_s29 }
  0x3a   : > { %p2794_p5 = pneg %p2793_p0  ;;  %p2799_p1 = scmp.lt.s32.totalorder %s2797_s6, %s2790_s14 }
  0x3c   : > { %p2800_p4 = por %p2799_p1, %p2798_p10 }
  0x3e   : > { %p2801_p6 = pnand %p2800_p4, %p2794_p5 }
  0x40   : > { %2804 = shalt.err (!%p2801_p6)
}
  0x41   : > { %s2896_s5 = smov 256   ;;  %s2897_s8 = smov 16  }
  0x42   : > { %2521 = dma.hbm_to_vmem [thread:$0]  (!%p3037_p11), %s218_s10, 8192, %s220_s12, %s206_s13, %s2896_s5, %s2896_s5, %s2897_s8  }
  0x43   : > { %231 = sbr.rel (%p2980_p8) target bundleno = 740 (0x2e4), region = 36 }
  0x48   : > { %s3048_s30 = sand.u32 1, %s2873_s16   ;;  %p3397_p12 = scmp.ne.s32.totalorder %s3391_s25, 0 }
  0x49   : > { %s2022_s9 = sshll.u32 %s3048_s30, 9  ;;  %s234_s11 = scalar_lea.sflag [#allocation3], %s3048_s30 }
  0x4a   : > { %s3052_s14 = scalar_lea.vmem [#allocation2], %s2022_s9 }
  0x4b   : > { %2856 = dma.done.wait (%p3397_p12), %s234_s11, 8192  }
  0x4c   : > { %2858 = vsyncadd (%p3397_p12), %s234_s11, 4294959104  ;;  %p3398_p3 = scmp.ne.s32.totalorder %s3389_s23, 0 }
  0x4e   : > { %2860 = dma.done.wait (%p3398_p3), [#allocation6], 5120  }
  0x4f   : > { %2862 = vsyncadd (%p3398_p3), [#allocation6], 4294962176  ;;  %v2589_v0 = vld [vmem:[#allocation7 + $0x38] sm:$0xff]   ;;  %v2590_v1 = vld [vmem:[#allocation7 + $0x30] sm:$0xff]   ;;  %s2025_s27 = sshll.u32 %s3048_s30, 8  ;;  %s2138_s12 = sshll.u32 %s2881_s18, 12 }
  0x50   : > { %2403 = vmatprep.subr.bf16.mxu0 %v2589_v0  ;;  %2483 = vmatprep.subr.bf16.mxu1 %v2589_v0  ;;  %v2591_v2 = vld [vmem:[#allocation7 + $0x28] sm:$0xff]   ;;  %v2592_v3 = vld [vmem:[#allocation7 + $0x20] sm:$0xff]   ;;  %v2593_v6 = vld [vmem:[#allocation7 + $0x18] sm:$0xff]   ;;  %s3253_s10 = scalar_lea.vmem [#allocation8], %s2025_s27  ;;  %s3322_s29 = scalar_lea.hbm %s3377_s4, %s2138_s12 }
  0x51   : > { %2404 = vmatpush3.bf16.msra.mxu0 %v2589_v0  ;;  %2491 = vmatpush3.bf16.msra.mxu1 %v2589_v0  ;;  %v2597_v4 = vld [vmem:[#allocation5] sm:$0xff]   ;;  %v2594_v7 = vld [vmem:[#allocation7 + $0x10] sm:$0xff]   ;;  %v2595_v8 = vld [vmem:[#allocation7 + $0x8] sm:$0xff]   ;;  %s1906_s24 = sshll.u32 %s3253_s10, 4  ;;  %s1893_s6 = scalar_lea.sflag [#allocation4], %s3048_s30  ;;  %s3324_s24 = int_to_ptr.vmem [resolvable:$true] %s1906_s24 }
  0x52   : > { %2405 = vmatprep.subr.bf16.mxu0 %v2590_v1  ;;  %2484 = vmatprep.subr.bf16.mxu1 %v2590_v1  ;;  %v2598_v5 = vld [vmem:[#allocation5 + $0x80] sm:$0xff]   ;;  %v2599_v10 = vld [vmem:[#allocation5 + $0x8] sm:$0xff]   ;;  %v2601_v12 = vld [vmem:[#allocation5 + $0x10] sm:$0xff]   ;;  %s2805_s5 = scalar_lea.vmem %s3324_s24, 4096  ;;  %s2898_s18 = smov [#allocation8]  }
  0x53   : > { %2419 = vmatprep.mubr.bf16.mxu0 %v2597_v4  ;;  %2451 = vmatprep.mubr.bf16.mxu1 %v2598_v5  ;;  %v2596_v9 = vld [vmem:[#allocation7] sm:$0xff]   ;;  %v2600_v11 = vld [vmem:[#allocation5 + $0x88] sm:$0xff]   ;;  %v2602_v13 = vld [vmem:[#allocation5 + $0x90] sm:$0xff]   ;;  %p2806_p8 = scmp.ne.s32.totalorder %s3324_s24, %s2805_s5  ;;  %s2809_s8 = sshll.u32 %s2898_s18, 4  ;;  %s2810_s8 = int_to_ptr.vmem [resolvable:$false] %s2809_s8 }
  0x54   : > { %v2603_v14 = vld [vmem:[#allocation5 + $0x18] sm:$0xff]   ;;  %v2605_v16 = vld [vmem:[#allocation5 + $0x20] sm:$0xff]   ;;  %v2607_v18 = vld [vmem:[#allocation5 + $0x28] sm:$0xff]   ;;  %s2811_s9 = scalar_lea.vmem %s2810_s8, 8192  ;;  %p2812_p2 = scmp.lt.s32.totalorder %s3324_s24, %s2810_s8 }
  0x55   : > { %2406 = vmatpush3.bf16.msra.mxu0 %v2590_v1  ;;  %2492 = vmatpush3.bf16.msra.mxu1 %v2590_v1  ;;  %v2604_v15 = vld [vmem:[#allocation5 + $0x98] sm:$0xff]   ;;  %v2606_v17 = vld [vmem:[#allocation5 + $0xa0] sm:$0xff]   ;;  %v2608_v19 = vld [vmem:[#allocation5 + $0xa8] sm:$0xff]   ;;  %p2807_p9 = pnand %p2806_p8, %p3021_p7  ;;  %p2813_p13 = scmp.lt.s32.totalorder %s2811_s9, %s2805_s5 }
  0x56   : > { %2407 = vmatprep.subr.bf16.mxu0 %v2591_v2  ;;  %2485 = vmatprep.subr.bf16.mxu1 %v2591_v2  ;;  %v2609_v20 = vld [vmem:[#allocation5 + $0x30] sm:$0xff]   ;;  %v2611_v22 = vld [vmem:[#allocation5 + $0x38] sm:$0xff]   ;;  %v2613_v24 = vld [vmem:[#allocation5 + $0x40] sm:$0xff]  }
  0x57   : > { %v2610_v21 = vld [vmem:[#allocation5 + $0xb0] sm:$0xff]   ;;  %v2612_v23 = vld [vmem:[#allocation5 + $0xb8] sm:$0xff]   ;;  %v2614_v25 = vld [vmem:[#allocation5 + $0xc0] sm:$0xff]   ;;  %p2808_p11 = pneg %p2807_p9  ;;  %p2814_p0 = por %p2813_p13, %p2812_p2 }
  0x58   : > { %v2615_v26 = vld [vmem:[#allocation5 + $0x48] sm:$0xff]   ;;  %v2617_v28 = vld [vmem:[#allocation5 + $0x50] sm:$0xff]   ;;  %v2619_v30 = vld [vmem:[#allocation5 + $0x58] sm:$0xff]  }
  0x59   : > { %2408 = vmatpush3.bf16.msra.mxu0 %v2591_v2  ;;  %2493 = vmatpush3.bf16.msra.mxu1 %v2591_v2  ;;  %v2616_v27 = vld [vmem:[#allocation5 + $0xc8] sm:$0xff]   ;;  %v2618_v29 = vld [vmem:[#allocation5 + $0xd0] sm:$0xff]   ;;  %v2620_v31 = vld [vmem:[#allocation5 + $0xd8] sm:$0xff]   ;;  %p2815_p5 = pnand %p2814_p0, %p2808_p11 }
  0x5a   : > { %2409 = vmatprep.subr.bf16.mxu0 %v2592_v3  ;;  %2486 = vmatprep.subr.bf16.mxu1 %v2592_v3  ;;  %v2621_v32 = vld [vmem:[#allocation5 + $0x60] sm:$0xff]   ;;  %v2623_v34 = vld [vmem:[#allocation5 + $0x68] sm:$0xff]   ;;  %v2625_v36 = vld [vmem:[#allocation5 + $0x70] sm:$0xff]  }
  0x5b   : > { %v2622_v33 = vld [vmem:[#allocation5 + $0xe0] sm:$0xff]   ;;  %v2624_v35 = vld [vmem:[#allocation5 + $0xe8] sm:$0xff]   ;;  %v2626_v37 = vld [vmem:[#allocation5 + $0xf0] sm:$0xff]  }
  0x5c   : > { %v2627_v38 = vld [vmem:[#allocation5 + $0x78] sm:$0xff]   ;;  %v2631_v40 = vld [vmem:[%s3052_s14 + $0x4] ss:$16 sps:$4 sm:$0xff]  }
  0x5d   : > { %2410 = vmatpush3.bf16.msra.mxu0 %v2592_v3  ;;  %2494 = vmatpush3.bf16.msra.mxu1 %v2592_v3  ;;  %v2628_v39 = vld [vmem:[#allocation5 + $0xf8] sm:$0xff]  }
  0x5e   : > { %2411 = vmatprep.subr.bf16.mxu0 %v2593_v6  ;;  %2487 = vmatprep.subr.bf16.mxu1 %v2593_v6  ;;  %v2634_v41 = vld [vmem:[%s3052_s14 + $0xc] ss:$16 sps:$4 sm:$0xff]  }
  0x61   : > { %2412 = vmatpush3.bf16.msra.mxu0 %v2593_v6  ;;  %2495 = vmatpush3.bf16.msra.mxu1 %v2593_v6 }
  0x62   : > { %2413 = vmatprep.subr.bf16.mxu0 %v2594_v7  ;;  %2488 = vmatprep.subr.bf16.mxu1 %v2594_v7 }
  0x65   : > { %2414 = vmatpush3.bf16.msra.mxu0 %v2594_v7  ;;  %2496 = vmatpush3.bf16.msra.mxu1 %v2594_v7 }
  0x66   : > { %2415 = vmatprep.subr.bf16.mxu0 %v2595_v8  ;;  %2489 = vmatprep.subr.bf16.mxu1 %v2595_v8 }
  0x69   : > { %2416 = vmatpush3.bf16.msra.mxu0 %v2595_v8  ;;  %2497 = vmatpush3.bf16.msra.mxu1 %v2595_v8 }
  0x6a   : > { %2417 = vmatprep.subr.bf16.mxu0 %v2596_v9  ;;  %2490 = vmatprep.subr.bf16.mxu1 %v2596_v9 }
  0x6d   : > { %2418 = vmatpush3.bf16.msra.mxu0 %v2596_v9  ;;  %2498 = vmatpush3.bf16.msra.mxu1 %v2596_v9 }
  0x70   : > { %2420 = vmatmul.mubr.bf16.vlgmr.msra.gmra.mxu0 %v2599_v10  ;;  %2452 = vmatmul.mubr.bf16.vlgmr.msra.gmra.mxu1 %v2600_v11 }
  0x71   : > { %2423 = vmatprep.mubr.bf16.mxu0 %v2601_v12  ;;  %2455 = vmatprep.mubr.bf16.mxu1 %v2602_v13 }
  0x78   : > { %2424 = vmatmul.mubr.bf16.gmra.mxu0 %v2603_v14  ;;  %2456 = vmatmul.mubr.bf16.gmra.mxu1 %v2604_v15 }
  0x79   : > { %2427 = vmatprep.mubr.bf16.mxu0 %v2605_v16  ;;  %2459 = vmatprep.mubr.bf16.mxu1 %v2606_v17 }
  0x80   : > { %2428 = vmatmul.mubr.bf16.gmra.mxu0 %v2607_v18  ;;  %2460 = vmatmul.mubr.bf16.gmra.mxu1 %v2608_v19 }
  0x81   : > { %2431 = vmatprep.mubr.bf16.mxu0 %v2609_v20  ;;  %2463 = vmatprep.mubr.bf16.mxu1 %v2610_v21 }
  0x88   : > { %2432 = vmatmul.mubr.bf16.gmra.mxu0 %v2611_v22  ;;  %2464 = vmatmul.mubr.bf16.gmra.mxu1 %v2612_v23 }
  0x89   : > { %2435 = vmatprep.mubr.bf16.mxu0 %v2613_v24  ;;  %2467 = vmatprep.mubr.bf16.mxu1 %v2614_v25 }
  0x90   : > { %2436 = vmatmul.mubr.bf16.gmra.mxu0 %v2615_v26  ;;  %2468 = vmatmul.mubr.bf16.gmra.mxu1 %v2616_v27 }
  0x91   : > { %2439 = vmatprep.mubr.bf16.mxu0 %v2617_v28  ;;  %2471 = vmatprep.mubr.bf16.mxu1 %v2618_v29 }
  0x98   : > { %2440 = vmatmul.mubr.bf16.gmra.mxu0 %v2619_v30  ;;  %2472 = vmatmul.mubr.bf16.gmra.mxu1 %v2620_v31 }
  0x99   : > { %2443 = vmatprep.mubr.bf16.mxu0 %v2621_v32  ;;  %2475 = vmatprep.mubr.bf16.mxu1 %v2622_v33 }
  0xa0   : > { %2444 = vmatmul.mubr.bf16.gmra.mxu0 %v2623_v34  ;;  %2476 = vmatmul.mubr.bf16.gmra.mxu1 %v2624_v35 }
  0xa1   : > { %2447 = vmatprep.mubr.bf16.mxu0 %v2625_v36  ;;  %2479 = vmatprep.mubr.bf16.mxu1 %v2626_v37 }
  0xa8   : > { %2448 = vmatmul.mubr.bf16.gmra.mxu0 %v2627_v38  ;;  %2480 = vmatmul.mubr.bf16.gmra.mxu1 %v2628_v39 }
  0xa9   : > { %1332 = vmatprep.mubr.bf16.mxu1 %v2631_v40  ;;  %1493 = vmatprep.mubr.bf16.mxu0 %v2634_v41 }
 0x130   : > { %v3064_v42 = vpop.f32.mrf.mxu0  ;;  %v3066_v43 = vpop.f32.mrf.mxu1 }
 0x131   : > { %3399 = vst [vmem:[#allocation12_spill] sm:$0xff] %v3064_v42  ;;  %3400 = vst [vmem:[#allocation13_spill] sm:$0xff] %v3066_v43 }
 0x132   : > { %v3068_v44 = vpop.f32.mrf.mxu0  ;;  %v3070_v45 = vpop.f32.mrf.mxu1 }
 0x133   : > { %3401 = vst [vmem:[#allocation14_spill] sm:$0xff] %v3068_v44  ;;  %3402 = vst [vmem:[#allocation15_spill] sm:$0xff] %v3070_v45 }
 0x134   : > { %v3072_v46 = vpop.f32.mrf.mxu0  ;;  %v3074_v47 = vpop.f32.mrf.mxu1 }
 0x135   : > { %3403 = vst [vmem:[#allocation16_spill] sm:$0xff] %v3072_v46  ;;  %3404 = vst [vmem:[#allocation17_spill] sm:$0xff] %v3074_v47 }
 0x136   : > { %v3080_v50 = vpop.f32.mrf.mxu0  ;;  %v3082_v51 = vpop.f32.mrf.mxu1 }
 0x137   : > { %3405 = vst [vmem:[#allocation18_spill] sm:$0xff] %v3080_v50  ;;  %3406 = vst [vmem:[#allocation19_spill] sm:$0xff] %v3082_v51 }
 0x138   : > { %v3088_v54 = vpop.f32.mrf.mxu0  ;;  %v3090_v55 = vpop.f32.mrf.mxu1 }
 0x13a   : > { %v3092_v56 = vpop.f32.mrf.mxu0  ;;  %v3094_v57 = vpop.f32.mrf.mxu1 }
 0x13c   : > { %v3096_v58 = vpop.f32.mrf.mxu0  ;;  %v3098_v59 = vpop.f32.mrf.mxu1 }
 0x13e   : > { %v3104_v62 = vpop.f32.mrf.mxu0  ;;  %v3106_v63 = vpop.f32.mrf.mxu1 }
 0x140   : > { %v3112_v2 = vpop.f32.mrf.mxu0  ;;  %v3114_v3 = vpop.f32.mrf.mxu1 }
 0x142   : > { %v3116_v4 = vpop.f32.mrf.mxu0  ;;  %v3118_v5 = vpop.f32.mrf.mxu1 }
 0x144   : > { %v3120_v6 = vpop.f32.mrf.mxu0  ;;  %v3122_v7 = vpop.f32.mrf.mxu1 }
 0x146   : > { %v3124_v8 = vpop.f32.mrf.mxu0  ;;  %v3126_v9 = vpop.f32.mrf.mxu1 }
 0x148   : > { %v2433_v10 = vpop.f32.mrf.mxu0  ;;  %v2465_v11 = vpop.f32.mrf.mxu1 }
 0x14a   : > { %v677_v12 = vpop.f32.mrf.mxu0  ;;  %v805_v13 = vpop.f32.mrf.mxu1 }
 0x14c   : > { %v2434_v14 = vpop.f32.mrf.mxu0  ;;  %v2466_v15 = vpop.f32.mrf.mxu1 }
 0x14d   : > { %v891_v45 = vpack.c.bf16 %v2434_v14, %v2433_v10  ;;  %v907_v51 = vpack.c.bf16 %v2466_v15, %v2465_v11  ;;  %v3425_v10 = vld [vmem:[#allocation15_spill] sm:$0xff]  ;;  %v2639_v14 = vld [vmem:[%s3052_s14 + $0x20] ss:$16 sps:$4 sm:$0xff]  }
 0x14e   : > { %v680_v16 = vpop.f32.mrf.mxu0  ;;  %v808_v17 = vpop.f32.mrf.mxu1  ;;  %v2640_v15 = vld [vmem:[%s3052_s14 + $0x28] ss:$16 sps:$4 sm:$0xff]  }
 0x14f   : > { %v890_v42 = vpack.c.bf16 %v680_v16, %v677_v12  ;;  %v906_v46 = vpack.c.bf16 %v808_v17, %v805_v13  ;;  %v2635_v12 = vld [vmem:[%s3052_s14 + $0x24] ss:$16 sps:$4 sm:$0xff]   ;;  %v2637_v13 = vld [vmem:[%s3052_s14 + $0x2c] ss:$16 sps:$4 sm:$0xff]  }
 0x150   : > { %v3128_v18 = vpop.f32.mrf.mxu0  ;;  %v3130_v19 = vpop.f32.mrf.mxu1  ;;  %v2641_v16 = vld [vmem:[%s3052_s14 + $0x44] ss:$16 sps:$4 sm:$0xff]   ;;  %v2643_v17 = vld [vmem:[%s3052_s14 + $0x4c] ss:$16 sps:$4 sm:$0xff]  }
 0x152   : > { %v3132_v20 = vpop.f32.mrf.mxu0  ;;  %v3134_v21 = vpop.f32.mrf.mxu1 }
 0x153   : > { %3407 = vst [vmem:[#allocation20_spill] sm:$0xff] %v3134_v21 }
 0x154   : > { %v3136_v22 = vpop.f32.mrf.mxu0  ;;  %v3138_v23 = vpop.f32.mrf.mxu1 }
 0x156   : > { %v3140_v24 = vpop.f32.mrf.mxu0  ;;  %v3142_v25 = vpop.f32.mrf.mxu1 }
 0x157   : > { %3408 = vst [vmem:[#allocation21_spill] sm:$0xff] %v3142_v25 }
 0x158   : > { %v2441_v26 = vpop.f32.mrf.mxu0  ;;  %v2473_v27 = vpop.f32.mrf.mxu1 }
 0x15a   : > { %v709_v28 = vpop.f32.mrf.mxu0  ;;  %v837_v29 = vpop.f32.mrf.mxu1 }
 0x15c   : > { %v2442_v30 = vpop.f32.mrf.mxu0  ;;  %v2474_v31 = vpop.f32.mrf.mxu1 }
 0x15e   : > { %v712_v32 = vpop.f32.mrf.mxu0  ;;  %v840_v33 = vpop.f32.mrf.mxu1 }
 0x160   : > { %v2445_v34 = vpop.f32.mrf.mxu0  ;;  %v2477_v35 = vpop.f32.mrf.mxu1 }
 0x162   : > { %v725_v36 = vpop.f32.mrf.mxu0  ;;  %v853_v37 = vpop.f32.mrf.mxu1 }
 0x164   : > { %v2446_v38 = vpop.f32.mrf.mxu0  ;;  %v2478_v39 = vpop.f32.mrf.mxu1 }
 0x165   : > { %v897_v25 = vpack.c.bf16 %v2446_v38, %v2445_v34  ;;  %v913_v21 = vpack.c.bf16 %v2478_v39, %v2477_v35  ;;  %v2669_v34 = vld [vmem:[%s3052_s14 + $0xc0] ss:$16 sps:$4 sm:$0xff]   ;;  %v2670_v35 = vld [vmem:[%s3052_s14 + $0xc8] ss:$16 sps:$4 sm:$0xff]  }
 0x166   : > { %v728_v40 = vpop.f32.mrf.mxu0  ;;  %v856_v41 = vpop.f32.mrf.mxu1  ;;  %v2675_v38 = vld [vmem:[%s3052_s14 + $0xe0] ss:$16 sps:$4 sm:$0xff]   ;;  %v2676_v39 = vld [vmem:[%s3052_s14 + $0xe8] ss:$16 sps:$4 sm:$0xff]  }
 0x168   : > { %v2449_v53 = vpop.f32.mrf.mxu0  ;;  %v2481_v52 = vpop.f32.mrf.mxu1 }
 0x16a   : > { %v741_v49 = vpop.f32.mrf.mxu0  ;;  %v869_v48 = vpop.f32.mrf.mxu1 }
 0x16c   : > { %v2450_v1 = vpop.f32.mrf.mxu0  ;;  %v2482_v0 = vpop.f32.mrf.mxu1 }
 0x16d   : > { %v899_v61 = vpack.c.bf16 %v2450_v1, %v2449_v53  ;;  %v915_v60 = vpack.c.bf16 %v2482_v0, %v2481_v52  ;;  %v889_v52 = vpack.c.bf16 %v3120_v6, %v3112_v2  ;;  %v3410_v53 = vpack.c.bf16 %v3098_v59, %v3090_v55  ;;  %v3414_v59 = vld [vmem:[#allocation21_spill] sm:$0xff]  ;;  %v3415_v2 = vld [vmem:[#allocation16_spill] sm:$0xff]  ;;  %v3421_v6 = vld [vmem:[#allocation18_spill] sm:$0xff] }
 0x16e   : > { %v744_v44 = vpop.f32.mrf.mxu0  ;;  %v872_v50 = vpop.f32.mrf.mxu1  ;;  %v3411_v0 = vpack.c.bf16 %v3104_v62, %v3092_v56  ;;  %v892_v55 = vpack.c.bf16 %v3140_v24, %v3132_v20  ;;  %v3418_v56 = vld [vmem:[#allocation17_spill] sm:$0xff]  ;;  %v2647_v20 = vld [vmem:[%s3052_s14 + $0x64] ss:$16 sps:$4 sm:$0xff]  }
 0x16f   : > { %v898_v43 = vpack.c.bf16 %v744_v44, %v741_v49  ;;  %v914_v47 = vpack.c.bf16 %v872_v50, %v869_v48  ;;  %2179 = vmatprep.subr.bf16.mxu1 %v899_v61  ;;  %2291 = vmatprep.subr.bf16.mxu0 %v915_v60  ;;  %v905_v44 = vpack.c.bf16 %v3122_v7, %v3114_v3  ;;  %v3416_v3 = vld [vmem:[#allocation12_spill] sm:$0xff]  ;;  %v3419_v62 = vld [vmem:[#allocation13_spill] sm:$0xff]  ;;  %v3422_v7 = vld [vmem:[#allocation14_spill] sm:$0xff] }
 0x170   : > { %2180 = vmatpush3.bf16.msra.mxu1 %v891_v45  ;;  %2292 = vmatpush3.bf16.msra.mxu0 %v907_v51  ;;  %v896_v48 = vpack.c.bf16 %v728_v40, %v725_v36  ;;  %v912_v49 = vpack.c.bf16 %v856_v41, %v853_v37  ;;  %v895_v45 = vpack.c.bf16 %v2442_v30, %v2441_v26  ;;  %v2653_v24 = vld [vmem:[%s3052_s14 + $0x84] ss:$16 sps:$4 sm:$0xff]   ;;  %v2657_v26 = vld [vmem:[%s3052_s14 + $0x80] ss:$16 sps:$4 sm:$0xff]   ;;  %v2673_v37 = vld [vmem:[%s3052_s14 + $0xec] ss:$16 sps:$4 sm:$0xff]  }
 0x171   : > { %2181 = vmatprep.subr.bf16.mxu1 %v898_v43  ;;  %2293 = vmatprep.subr.bf16.mxu0 %v914_v47  ;;  %v888_v43 = vpack.c.bf16 %v3124_v8, %v3116_v4  ;;  %v894_v47 = vpack.c.bf16 %v712_v32, %v709_v28  ;;  %v910_v50 = vpack.c.bf16 %v840_v33, %v837_v29  ;;  %v2659_v28 = vld [vmem:[%s3052_s14 + $0xa4] ss:$16 sps:$4 sm:$0xff]   ;;  %v2661_v29 = vld [vmem:[%s3052_s14 + $0xac] ss:$16 sps:$4 sm:$0xff]   ;;  %v2663_v30 = vld [vmem:[%s3052_s14 + $0xa0] ss:$16 sps:$4 sm:$0xff]  }
 0x172   : > { %v3409_v51 = vpack.c.bf16 %v3096_v58, %v3088_v54  ;;  %v893_v60 = vpack.c.bf16 %v3136_v22, %v3128_v18  ;;  %v909_v61 = vpack.c.bf16 %v3138_v23, %v3130_v19  ;;  %v3412_v54 = vpack.c.bf16 %v3106_v63, %v3094_v57  ;;  %v3413_v58 = vld [vmem:[#allocation20_spill] sm:$0xff]  ;;  %v2632_v63 = vld [vmem:[%s3052_s14 + $0x8] ss:$16 sps:$4 sm:$0xff]   ;;  %v2667_v33 = vld [vmem:[%s3052_s14 + $0xcc] ss:$16 sps:$4 sm:$0xff]  }
 0x173   : > { %v908_v1 = vpack.c.bf16 %v3414_v59, %v3413_v58  ;;  %v3417_v4 = vpack.c.bf16 %v3415_v2, %v3416_v3  ;;  %v2629_v57 = vld [vmem:[%s3052_s14] ss:$16 sps:$4 sm:$0xff]   ;;  %v3423_v8 = vpack.c.bf16 %v3421_v6, %v3422_v7  ;;  %v2646_v19 = vld [vmem:[%s3052_s14 + $0x48] ss:$16 sps:$4 sm:$0xff]   ;;  %v2665_v32 = vld [vmem:[%s3052_s14 + $0xc4] ss:$16 sps:$4 sm:$0xff]  }
 0x174   : > { %2182 = vmatpush3.bf16.msra.mxu1 %v890_v42  ;;  %2294 = vmatpush3.bf16.msra.mxu0 %v906_v46  ;;  %v904_v42 = vpack.c.bf16 %v3126_v9, %v3118_v5  ;;  %v911_v46 = vpack.c.bf16 %v2474_v31, %v2473_v27  ;;  %v3420_v5 = vpack.c.bf16 %v3418_v56, %v3419_v62  ;;  %v3424_v9 = vld [vmem:[#allocation19_spill] sm:$0xff]  ;;  %v2645_v18 = vld [vmem:[%s3052_s14 + $0x40] ss:$16 sps:$4 sm:$0xff]   ;;  %v2671_v36 = vld [vmem:[%s3052_s14 + $0xe4] ss:$16 sps:$4 sm:$0xff]  }
 0x175   : > { %2183 = vmatprep.subr.bf16.mxu1 %v897_v25  ;;  %2295 = vmatprep.subr.bf16.mxu0 %v913_v21  ;;  %v3426_v11 = vpack.c.bf16 %v3424_v9, %v3425_v10  ;;  %v2649_v21 = vld [vmem:[%s3052_s14 + $0x6c] ss:$16 sps:$4 sm:$0xff]   ;;  %v2651_v22 = vld [vmem:[%s3052_s14 + $0x60] ss:$16 sps:$4 sm:$0xff]   ;;  %v2652_v23 = vld [vmem:[%s3052_s14 + $0x68] ss:$16 sps:$4 sm:$0xff]  }
 0x176   : > { %v2655_v25 = vld [vmem:[%s3052_s14 + $0x8c] ss:$16 sps:$4 sm:$0xff]   ;;  %v2658_v27 = vld [vmem:[%s3052_s14 + $0x88] ss:$16 sps:$4 sm:$0xff]   ;;  %v2677_v40 = vld [vmem:[%s3052_s14 + $0x104] ss:$16 sps:$4 sm:$0xff]  }
 0x177   : > { %v2664_v31 = vld [vmem:[%s3052_s14 + $0xa8] ss:$16 sps:$4 sm:$0xff]   ;;  %v2679_v41 = vld [vmem:[%s3052_s14 + $0x10c] ss:$16 sps:$4 sm:$0xff]   ;;  %v2707_v59 = vld [vmem:[%s3052_s14 + $0x1a4] ss:$16 sps:$4 sm:$0xff]  }
 0x178   : > { %2184 = vmatpush3.bf16.msra.mxu1 %v889_v52  ;;  %2296 = vmatpush3.bf16.msra.mxu0 %v905_v44  ;;  %v2681_v52 = vld [vmem:[%s3052_s14 + $0x100] ss:$16 sps:$4 sm:$0xff]   ;;  %v2682_v44 = vld [vmem:[%s3052_s14 + $0x108] ss:$16 sps:$4 sm:$0xff]   ;;  %v2715_v56 = vld [vmem:[%s3052_s14 + $0x1cc] ss:$16 sps:$4 sm:$0xff]  }
 0x179   : > { %2185 = vmatprep.subr.bf16.mxu1 %v896_v48  ;;  %2297 = vmatprep.subr.bf16.mxu0 %v912_v49  ;;  %v2683_v48 = vld [vmem:[%s3052_s14 + $0x124] ss:$16 sps:$4 sm:$0xff]   ;;  %v2685_v49 = vld [vmem:[%s3052_s14 + $0x12c] ss:$16 sps:$4 sm:$0xff]   ;;  %v2706_v58 = vld [vmem:[%s3052_s14 + $0x188] ss:$16 sps:$4 sm:$0xff]  }
 0x17a   : > { %v2711_v2 = vld [vmem:[%s3052_s14 + $0x1a0] ss:$16 sps:$4 sm:$0xff]   ;;  %v2712_v3 = vld [vmem:[%s3052_s14 + $0x1a8] ss:$16 sps:$4 sm:$0xff]  }
 0x17b   : > { %v2717_v62 = vld [vmem:[%s3052_s14 + $0x1c0] ss:$16 sps:$4 sm:$0xff]   ;;  %v2724_v7 = vld [vmem:[%s3052_s14 + $0x1e8] ss:$16 sps:$4 sm:$0xff]  }
 0x17c   : > { %2186 = vmatpush3.bf16.msra.mxu1 %v888_v43  ;;  %2298 = vmatpush3.bf16.msra.mxu0 %v904_v42  ;;  %v2687_v43 = vld [vmem:[%s3052_s14 + $0x120] ss:$16 sps:$4 sm:$0xff]   ;;  %v2688_v42 = vld [vmem:[%s3052_s14 + $0x128] ss:$16 sps:$4 sm:$0xff]  }
 0x17d   : > { %2187 = vmatprep.subr.bf16.mxu1 %v895_v45  ;;  %2299 = vmatprep.subr.bf16.mxu0 %v911_v46  ;;  %v2689_v45 = vld [vmem:[%s3052_s14 + $0x144] ss:$16 sps:$4 sm:$0xff]   ;;  %v2691_v46 = vld [vmem:[%s3052_s14 + $0x14c] ss:$16 sps:$4 sm:$0xff]   ;;  %v2723_v6 = vld [vmem:[%s3052_s14 + $0x1e0] ss:$16 sps:$4 sm:$0xff]  }
 0x180   : > { %2188 = vmatpush3.bf16.msra.mxu1 %v3409_v51  ;;  %2300 = vmatpush3.bf16.msra.mxu0 %v3410_v53  ;;  %v2695_v51 = vld [vmem:[%s3052_s14 + $0x164] ss:$16 sps:$4 sm:$0xff]   ;;  %v2697_v53 = vld [vmem:[%s3052_s14 + $0x16c] ss:$16 sps:$4 sm:$0xff]  }
 0x181   : > { %2189 = vmatprep.subr.bf16.mxu1 %v894_v47  ;;  %2301 = vmatprep.subr.bf16.mxu0 %v910_v50  ;;  %v2693_v47 = vld [vmem:[%s3052_s14 + $0x140] ss:$16 sps:$4 sm:$0xff]   ;;  %v2694_v50 = vld [vmem:[%s3052_s14 + $0x148] ss:$16 sps:$4 sm:$0xff]  }
 0x184   : > { %2190 = vmatpush3.bf16.msra.mxu1 %v3411_v0  ;;  %2302 = vmatpush3.bf16.msra.mxu0 %v3412_v54  ;;  %v2701_v0 = vld [vmem:[%s3052_s14 + $0x184] ss:$16 sps:$4 sm:$0xff]   ;;  %v2703_v54 = vld [vmem:[%s3052_s14 + $0x18c] ss:$16 sps:$4 sm:$0xff]  }
 0x185   : > { %2191 = vmatprep.subr.bf16.mxu1 %v893_v60  ;;  %2303 = vmatprep.subr.bf16.mxu0 %v909_v61  ;;  %v2699_v60 = vld [vmem:[%s3052_s14 + $0x160] ss:$16 sps:$4 sm:$0xff]   ;;  %v2700_v61 = vld [vmem:[%s3052_s14 + $0x168] ss:$16 sps:$4 sm:$0xff]  }
 0x188   : > { %2192 = vmatpush3.bf16.msra.mxu1 %v3417_v4  ;;  %2304 = vmatpush3.bf16.msra.mxu0 %v3420_v5  ;;  %v2713_v4 = vld [vmem:[%s3052_s14 + $0x1c4] ss:$16 sps:$4 sm:$0xff]   ;;  %v2718_v5 = vld [vmem:[%s3052_s14 + $0x1c8] ss:$16 sps:$4 sm:$0xff]  }
 0x189   : > { %2193 = vmatprep.subr.bf16.mxu1 %v892_v55  ;;  %2305 = vmatprep.subr.bf16.mxu0 %v908_v1  ;;  %v2705_v55 = vld [vmem:[%s3052_s14 + $0x180] ss:$16 sps:$4 sm:$0xff]   ;;  %v2709_v1 = vld [vmem:[%s3052_s14 + $0x1ac] ss:$16 sps:$4 sm:$0xff]  }
 0x18c   : > { %2194 = vmatpush3.bf16.msra.mxu1 %v3423_v8  ;;  %2306 = vmatpush3.bf16.msra.mxu0 %v3426_v11 }
 0x18f   : > { %1333 = vmatmul.mubr.bf16.vlgmr.msra.gmra.mxu1 %v2629_v57  ;;  %1494 = vmatmul.mubr.bf16.vlgmr.msra.gmra.mxu0 %v2632_v63  ;;  %v2719_v57 = vld [vmem:[%s3052_s14 + $0x1e4] ss:$16 sps:$4 sm:$0xff]   ;;  %v2721_v63 = vld [vmem:[%s3052_s14 + $0x1ec] ss:$16 sps:$4 sm:$0xff]  }
 0x190   : > { %1340 = vmatprep.mubr.bf16.mxu1 %v2635_v12  ;;  %1501 = vmatprep.mubr.bf16.mxu0 %v2637_v13 }
 0x197   : > { %1341 = vmatmul.mubr.bf16.gmra.mxu1 %v2639_v14  ;;  %1502 = vmatmul.mubr.bf16.gmra.mxu0 %v2640_v15 }
 0x198   : > { %1348 = vmatprep.mubr.bf16.mxu1 %v2641_v16  ;;  %1509 = vmatprep.mubr.bf16.mxu0 %v2643_v17  ;;  %v3249_v17 = vld [vmem:[%s3376_s3] ss:$0 sm:$0xff] }
 0x19f   : > { %1349 = vmatmul.mubr.bf16.gmra.mxu1 %v2645_v18  ;;  %1510 = vmatmul.mubr.bf16.gmra.mxu0 %v2646_v19 }
 0x1a0   : > { %1356 = vmatprep.mubr.bf16.mxu1 %v2647_v20  ;;  %1517 = vmatprep.mubr.bf16.mxu0 %v2649_v21 }
 0x1a7   : > { %1357 = vmatmul.mubr.bf16.gmra.mxu1 %v2651_v22  ;;  %1518 = vmatmul.mubr.bf16.gmra.mxu0 %v2652_v23 }
 0x1a8   : > { %1364 = vmatprep.mubr.bf16.mxu1 %v2653_v24  ;;  %1525 = vmatprep.mubr.bf16.mxu0 %v2655_v25 }
 0x1af   : > { %1365 = vmatmul.mubr.bf16.gmra.mxu1 %v2657_v26  ;;  %1526 = vmatmul.mubr.bf16.gmra.mxu0 %v2658_v27 }
 0x1b0   : > { %1372 = vmatprep.mubr.bf16.mxu1 %v2659_v28  ;;  %1533 = vmatprep.mubr.bf16.mxu0 %v2661_v29 }
 0x1b7   : > { %1373 = vmatmul.mubr.bf16.gmra.mxu1 %v2663_v30  ;;  %1534 = vmatmul.mubr.bf16.gmra.mxu0 %v2664_v31 }
 0x1b8   : > { %1380 = vmatprep.mubr.bf16.mxu1 %v2665_v32  ;;  %1541 = vmatprep.mubr.bf16.mxu0 %v2667_v33 }
 0x1bf   : > { %1381 = vmatmul.mubr.bf16.gmra.mxu1 %v2669_v34  ;;  %1542 = vmatmul.mubr.bf16.gmra.mxu0 %v2670_v35 }
 0x1c0   : > { %1388 = vmatprep.mubr.bf16.mxu1 %v2671_v36  ;;  %1549 = vmatprep.mubr.bf16.mxu0 %v2673_v37 }
 0x1c7   : > { %1389 = vmatmul.mubr.bf16.gmra.mxu1 %v2675_v38  ;;  %1550 = vmatmul.mubr.bf16.gmra.mxu0 %v2676_v39 }
 0x1c8   : > { %1396 = vmatprep.mubr.bf16.mxu1 %v2677_v40  ;;  %1557 = vmatprep.mubr.bf16.mxu0 %v2679_v41 }
 0x1cf   : > { %1397 = vmatmul.mubr.bf16.gmra.mxu1 %v2681_v52  ;;  %1558 = vmatmul.mubr.bf16.gmra.mxu0 %v2682_v44 }
 0x1d0   : > { %1404 = vmatprep.mubr.bf16.mxu1 %v2683_v48  ;;  %1565 = vmatprep.mubr.bf16.mxu0 %v2685_v49 }
 0x1d7   : > { %1405 = vmatmul.mubr.bf16.gmra.mxu1 %v2687_v43  ;;  %1566 = vmatmul.mubr.bf16.gmra.mxu0 %v2688_v42 }
 0x1d8   : > { %1412 = vmatprep.mubr.bf16.mxu1 %v2689_v45  ;;  %1573 = vmatprep.mubr.bf16.mxu0 %v2691_v46 }
 0x1df   : > { %1413 = vmatmul.mubr.bf16.gmra.mxu1 %v2693_v47  ;;  %1574 = vmatmul.mubr.bf16.gmra.mxu0 %v2694_v50 }
 0x1e0   : > { %1420 = vmatprep.mubr.bf16.mxu1 %v2695_v51  ;;  %1581 = vmatprep.mubr.bf16.mxu0 %v2697_v53 }
 0x1e7   : > { %1421 = vmatmul.mubr.bf16.gmra.mxu1 %v2699_v60  ;;  %1582 = vmatmul.mubr.bf16.gmra.mxu0 %v2700_v61 }
 0x1e8   : > { %1428 = vmatprep.mubr.bf16.mxu1 %v2701_v0  ;;  %1589 = vmatprep.mubr.bf16.mxu0 %v2703_v54 }
 0x1ef   : > { %1429 = vmatmul.mubr.bf16.gmra.mxu1 %v2705_v55  ;;  %1590 = vmatmul.mubr.bf16.gmra.mxu0 %v2706_v58 }
 0x1f0   : > { %1436 = vmatprep.mubr.bf16.mxu1 %v2707_v59  ;;  %1597 = vmatprep.mubr.bf16.mxu0 %v2709_v1 }
 0x1f7   : > { %1437 = vmatmul.mubr.bf16.gmra.mxu1 %v2711_v2  ;;  %1598 = vmatmul.mubr.bf16.gmra.mxu0 %v2712_v3 }
 0x1f8   : > { %1444 = vmatprep.mubr.bf16.mxu1 %v2713_v4  ;;  %1605 = vmatprep.mubr.bf16.mxu0 %v2715_v56 }
 0x1ff   : > { %1445 = vmatmul.mubr.bf16.gmra.mxu1 %v2717_v62  ;;  %1606 = vmatmul.mubr.bf16.gmra.mxu0 %v2718_v5 }
 0x200   : > { %1452 = vmatprep.mubr.bf16.mxu1 %v2719_v57  ;;  %1613 = vmatprep.mubr.bf16.mxu0 %v2721_v63 }
 0x207   : > { %1453 = vmatmul.mubr.bf16.gmra.mxu1 %v2723_v6  ;;  %1614 = vmatmul.mubr.bf16.gmra.mxu0 %v2724_v7 }
 0x24f   : > { %v2195_v8 = vpop.f32.mrf.mxu1  ;;  %v2307_v9 = vpop.f32.mrf.mxu0 }
 0x251   : > { %v2196_v10 = vpop.f32.mrf.mxu1  ;;  %v2308_v11 = vpop.f32.mrf.mxu0 }
 0x252   : > { %v2197_v12 = vadd.f32 %v2196_v10, %v2195_v8  ;;  %v2309_v13 = vadd.f32 %v2308_v11, %v2307_v9 }
 0x253   : > { %v2198_v14 = vpop.f32.mrf.mxu1  ;;  %v2310_v15 = vpop.f32.mrf.mxu0 }
 0x254   : > { %v1496_v16 = vadd.f32 %v2309_v13, %v2197_v12 }
 0x255   : > { %v2199_v18 = vpop.f32.mrf.mxu1  ;;  %v2311_v19 = vpop.f32.mrf.mxu0 }
 0x256   : > { %v2200_v20 = vadd.f32 %v2199_v18, %v2198_v14  ;;  %v2312_v21 = vadd.f32 %v2311_v19, %v2310_v15  ;;  %v1796_v24 = vadd.f32 %v3249_v17, %v1496_v16 }
 0x257   : > { %v2201_v22 = vpop.f32.mrf.mxu1  ;;  %v2313_v23 = vpop.f32.mrf.mxu0 }
 0x258   : > { %v1499_v25 = vadd.f32 %v2312_v21, %v2200_v20  ;;  %v1828_v28 = vmax.f32 %v1796_v24, 0.0 }
 0x259   : > { %v2202_v26 = vpop.f32.mrf.mxu1  ;;  %v2314_v27 = vpop.f32.mrf.mxu0 }
 0x25a   : > { %v2203_v29 = vadd.f32 %v2202_v26, %v2201_v22  ;;  %v2315_v30 = vadd.f32 %v2314_v27, %v2313_v23  ;;  %1860 = vst [vmem:[%s3253_s10] sm:$0xff] %v1828_v28  ;;  %v1797_v33 = vadd.f32 %v3249_v17, %v1499_v25 }
 0x25b   : > { %v2204_v31 = vpop.f32.mrf.mxu1  ;;  %v2316_v32 = vpop.f32.mrf.mxu0 }
 0x25c   : > { %v1504_v34 = vadd.f32 %v2315_v30, %v2203_v29  ;;  %v1829_v37 = vmax.f32 %v1797_v33, 0.0 }
 0x25d   : > { %v2205_v35 = vpop.f32.mrf.mxu1  ;;  %v2317_v36 = vpop.f32.mrf.mxu0 }
 0x25e   : > { %v2206_v38 = vadd.f32 %v2205_v35, %v2204_v31  ;;  %v2318_v39 = vadd.f32 %v2317_v36, %v2316_v32  ;;  %1861 = vst [vmem:[%s3253_s10 + $0x8] sm:$0xff] %v1829_v37  ;;  %v1798_v52 = vadd.f32 %v3249_v17, %v1504_v34 }
 0x25f   : > { %v2207_v40 = vpop.f32.mrf.mxu1  ;;  %v2319_v41 = vpop.f32.mrf.mxu0 }
 0x260   : > { %v1507_v44 = vadd.f32 %v2318_v39, %v2206_v38  ;;  %v1830_v43 = vmax.f32 %v1798_v52, 0.0 }
 0x261   : > { %v2208_v48 = vpop.f32.mrf.mxu1  ;;  %v2320_v49 = vpop.f32.mrf.mxu0 }
 0x262   : > { %v2209_v42 = vadd.f32 %v2208_v48, %v2207_v40  ;;  %v2321_v45 = vadd.f32 %v2320_v49, %v2319_v41  ;;  %1862 = vst [vmem:[%s3253_s10 + $0x10] sm:$0xff] %v1830_v43  ;;  %v1799_v50 = vadd.f32 %v3249_v17, %v1507_v44 }
 0x263   : > { %v2210_v46 = vpop.f32.mrf.mxu1  ;;  %v2322_v47 = vpop.f32.mrf.mxu0 }
 0x264   : > { %v1512_v51 = vadd.f32 %v2321_v45, %v2209_v42  ;;  %v1831_v61 = vmax.f32 %v1799_v50, 0.0 }
 0x265   : > { %v2211_v53 = vpop.f32.mrf.mxu1  ;;  %v2323_v60 = vpop.f32.mrf.mxu0 }
 0x266   : > { %v2212_v0 = vadd.f32 %v2211_v53, %v2210_v46  ;;  %v2324_v54 = vadd.f32 %v2323_v60, %v2322_v47  ;;  %1863 = vst [vmem:[%s3253_s10 + $0x18] sm:$0xff] %v1831_v61  ;;  %v1800_v59 = vadd.f32 %v3249_v17, %v1512_v51 }
 0x267   : > { %v2213_v55 = vpop.f32.mrf.mxu1  ;;  %v2325_v58 = vpop.f32.mrf.mxu0 }
 0x268   : > { %v1515_v1 = vadd.f32 %v2324_v54, %v2212_v0  ;;  %v1832_v4 = vmax.f32 %v1800_v59, 0.0 }
 0x269   : > { %v2214_v2 = vpop.f32.mrf.mxu1  ;;  %v2326_v3 = vpop.f32.mrf.mxu0 }
 0x26a   : > { %v2215_v56 = vadd.f32 %v2214_v2, %v2213_v55  ;;  %v2327_v62 = vadd.f32 %v2326_v3, %v2325_v58  ;;  %1864 = vst [vmem:[%s3253_s10 + $0x20] sm:$0xff] %v1832_v4  ;;  %v1801_v63 = vadd.f32 %v3249_v17, %v1515_v1 }
 0x26b   : > { %v2216_v5 = vpop.f32.mrf.mxu1  ;;  %v2328_v57 = vpop.f32.mrf.mxu0 }
 0x26c   : > { %v1520_v6 = vadd.f32 %v2327_v62, %v2215_v56  ;;  %v1833_v9 = vmax.f32 %v1801_v63, 0.0 }
 0x26d   : > { %v2217_v7 = vpop.f32.mrf.mxu1  ;;  %v2329_v8 = vpop.f32.mrf.mxu0 }
 0x26e   : > { %v2218_v10 = vadd.f32 %v2217_v7, %v2216_v5  ;;  %v2330_v11 = vadd.f32 %v2329_v8, %v2328_v57  ;;  %1865 = vst [vmem:[%s3253_s10 + $0x28] sm:$0xff] %v1833_v9  ;;  %v1802_v14 = vadd.f32 %v3249_v17, %v1520_v6 }
 0x26f   : > { %v2219_v12 = vpop.f32.mrf.mxu1  ;;  %v2331_v13 = vpop.f32.mrf.mxu0 }
 0x270   : > { %v1523_v15 = vadd.f32 %v2330_v11, %v2218_v10  ;;  %v1834_v19 = vmax.f32 %v1802_v14, 0.0 }
 0x271   : > { %v2220_v16 = vpop.f32.mrf.mxu1  ;;  %v2332_v18 = vpop.f32.mrf.mxu0 }
 0x272   : > { %v2221_v20 = vadd.f32 %v2220_v16, %v2219_v12  ;;  %v2333_v21 = vadd.f32 %v2332_v18, %v2331_v13  ;;  %1866 = vst [vmem:[%s3253_s10 + $0x30] sm:$0xff] %v1834_v19  ;;  %v1803_v24 = vadd.f32 %v3249_v17, %v1523_v15 }
 0x273   : > { %v2222_v22 = vpop.f32.mrf.mxu1  ;;  %v2334_v23 = vpop.f32.mrf.mxu0 }
 0x274   : > { %v1528_v25 = vadd.f32 %v2333_v21, %v2221_v20  ;;  %v1835_v28 = vmax.f32 %v1803_v24, 0.0 }
 0x275   : > { %v2223_v26 = vpop.f32.mrf.mxu1  ;;  %v2335_v27 = vpop.f32.mrf.mxu0 }
 0x276   : > { %v2224_v29 = vadd.f32 %v2223_v26, %v2222_v22  ;;  %v2336_v30 = vadd.f32 %v2335_v27, %v2334_v23  ;;  %1867 = vst [vmem:[%s3253_s10 + $0x38] sm:$0xff] %v1835_v28  ;;  %v1804_v33 = vadd.f32 %v3249_v17, %v1528_v25 }
 0x277   : > { %v2225_v31 = vpop.f32.mrf.mxu1  ;;  %v2337_v32 = vpop.f32.mrf.mxu0 }
 0x278   : > { %v1531_v34 = vadd.f32 %v2336_v30, %v2224_v29  ;;  %v1836_v37 = vmax.f32 %v1804_v33, 0.0 }
 0x279   : > { %v2226_v35 = vpop.f32.mrf.mxu1  ;;  %v2338_v36 = vpop.f32.mrf.mxu0 }
 0x27a   : > { %v2227_v38 = vadd.f32 %v2226_v35, %v2225_v31  ;;  %v2339_v39 = vadd.f32 %v2338_v36, %v2337_v32  ;;  %1868 = vst [vmem:[%s3253_s10 + $0x40] sm:$0xff] %v1836_v37  ;;  %v1805_v52 = vadd.f32 %v3249_v17, %v1531_v34 }
 0x27b   : > { %v2228_v40 = vpop.f32.mrf.mxu1  ;;  %v2340_v41 = vpop.f32.mrf.mxu0 }
 0x27c   : > { %v1536_v44 = vadd.f32 %v2339_v39, %v2227_v38  ;;  %v1837_v43 = vmax.f32 %v1805_v52, 0.0 }
 0x27d   : > { %v2229_v48 = vpop.f32.mrf.mxu1  ;;  %v2341_v49 = vpop.f32.mrf.mxu0 }
 0x27e   : > { %v2230_v42 = vadd.f32 %v2229_v48, %v2228_v40  ;;  %v2342_v45 = vadd.f32 %v2341_v49, %v2340_v41  ;;  %1869 = vst [vmem:[%s3253_s10 + $0x48] sm:$0xff] %v1837_v43  ;;  %v1806_v50 = vadd.f32 %v3249_v17, %v1536_v44 }
 0x27f   : > { %v2231_v46 = vpop.f32.mrf.mxu1  ;;  %v2343_v47 = vpop.f32.mrf.mxu0 }
 0x280   : > { %v1539_v51 = vadd.f32 %v2342_v45, %v2230_v42  ;;  %v1838_v61 = vmax.f32 %v1806_v50, 0.0 }
 0x281   : > { %v2232_v53 = vpop.f32.mrf.mxu1  ;;  %v2344_v60 = vpop.f32.mrf.mxu0 }
 0x282   : > { %v2233_v0 = vadd.f32 %v2232_v53, %v2231_v46  ;;  %v2345_v54 = vadd.f32 %v2344_v60, %v2343_v47  ;;  %1870 = vst [vmem:[%s3253_s10 + $0x50] sm:$0xff] %v1838_v61  ;;  %v1807_v59 = vadd.f32 %v3249_v17, %v1539_v51 }
 0x283   : > { %v2234_v55 = vpop.f32.mrf.mxu1  ;;  %v2346_v58 = vpop.f32.mrf.mxu0 }
 0x284   : > { %v1544_v1 = vadd.f32 %v2345_v54, %v2233_v0  ;;  %v1839_v4 = vmax.f32 %v1807_v59, 0.0 }
 0x285   : > { %v2235_v2 = vpop.f32.mrf.mxu1  ;;  %v2347_v3 = vpop.f32.mrf.mxu0 }
 0x286   : > { %v2236_v56 = vadd.f32 %v2235_v2, %v2234_v55  ;;  %v2348_v62 = vadd.f32 %v2347_v3, %v2346_v58  ;;  %1871 = vst [vmem:[%s3253_s10 + $0x58] sm:$0xff] %v1839_v4  ;;  %v1808_v63 = vadd.f32 %v3249_v17, %v1544_v1 }
 0x287   : > { %v2237_v5 = vpop.f32.mrf.mxu1  ;;  %v2349_v57 = vpop.f32.mrf.mxu0 }
 0x288   : > { %v1547_v6 = vadd.f32 %v2348_v62, %v2236_v56  ;;  %v1840_v9 = vmax.f32 %v1808_v63, 0.0 }
 0x289   : > { %v2238_v7 = vpop.f32.mrf.mxu1  ;;  %v2350_v8 = vpop.f32.mrf.mxu0 }
 0x28a   : > { %v2239_v10 = vadd.f32 %v2238_v7, %v2237_v5  ;;  %v2351_v11 = vadd.f32 %v2350_v8, %v2349_v57  ;;  %1872 = vst [vmem:[%s3253_s10 + $0x60] sm:$0xff] %v1840_v9  ;;  %v1809_v14 = vadd.f32 %v3249_v17, %v1547_v6 }
 0x28b   : > { %v2240_v12 = vpop.f32.mrf.mxu1  ;;  %v2352_v13 = vpop.f32.mrf.mxu0 }
 0x28c   : > { %v1552_v15 = vadd.f32 %v2351_v11, %v2239_v10  ;;  %v1841_v19 = vmax.f32 %v1809_v14, 0.0 }
 0x28d   : > { %v2241_v16 = vpop.f32.mrf.mxu1  ;;  %v2353_v18 = vpop.f32.mrf.mxu0 }
 0x28e   : > { %v2242_v20 = vadd.f32 %v2241_v16, %v2240_v12  ;;  %v2354_v21 = vadd.f32 %v2353_v18, %v2352_v13  ;;  %1873 = vst [vmem:[%s3253_s10 + $0x68] sm:$0xff] %v1841_v19  ;;  %v1810_v24 = vadd.f32 %v3249_v17, %v1552_v15 }
 0x28f   : > { %v2243_v22 = vpop.f32.mrf.mxu1  ;;  %v2355_v23 = vpop.f32.mrf.mxu0 }
 0x290   : > { %v1555_v25 = vadd.f32 %v2354_v21, %v2242_v20  ;;  %v1842_v28 = vmax.f32 %v1810_v24, 0.0 }
 0x291   : > { %v2244_v26 = vpop.f32.mrf.mxu1  ;;  %v2356_v27 = vpop.f32.mrf.mxu0 }
 0x292   : > { %v2245_v29 = vadd.f32 %v2244_v26, %v2243_v22  ;;  %v2357_v30 = vadd.f32 %v2356_v27, %v2355_v23  ;;  %1874 = vst [vmem:[%s3253_s10 + $0x70] sm:$0xff] %v1842_v28  ;;  %v1811_v33 = vadd.f32 %v3249_v17, %v1555_v25 }
 0x293   : > { %v2246_v31 = vpop.f32.mrf.mxu1  ;;  %v2358_v32 = vpop.f32.mrf.mxu0 }
 0x294   : > { %v1560_v34 = vadd.f32 %v2357_v30, %v2245_v29  ;;  %v1843_v37 = vmax.f32 %v1811_v33, 0.0 }
 0x295   : > { %v2247_v35 = vpop.f32.mrf.mxu1  ;;  %v2359_v36 = vpop.f32.mrf.mxu0 }
 0x296   : > { %v2248_v38 = vadd.f32 %v2247_v35, %v2246_v31  ;;  %v2360_v39 = vadd.f32 %v2359_v36, %v2358_v32  ;;  %1875 = vst [vmem:[%s3253_s10 + $0x78] sm:$0xff] %v1843_v37  ;;  %v1812_v52 = vadd.f32 %v3249_v17, %v1560_v34 }
 0x297   : > { %v2249_v40 = vpop.f32.mrf.mxu1  ;;  %v2361_v41 = vpop.f32.mrf.mxu0 }
 0x298   : > { %v1563_v44 = vadd.f32 %v2360_v39, %v2248_v38  ;;  %v1844_v43 = vmax.f32 %v1812_v52, 0.0 }
 0x299   : > { %v2250_v48 = vpop.f32.mrf.mxu1  ;;  %v2362_v49 = vpop.f32.mrf.mxu0 }
 0x29a   : > { %v2251_v42 = vadd.f32 %v2250_v48, %v2249_v40  ;;  %v2363_v45 = vadd.f32 %v2362_v49, %v2361_v41  ;;  %1876 = vst [vmem:[%s3253_s10 + $0x80] sm:$0xff] %v1844_v43  ;;  %v1813_v50 = vadd.f32 %v3249_v17, %v1563_v44 }
 0x29b   : > { %v2252_v46 = vpop.f32.mrf.mxu1  ;;  %v2364_v47 = vpop.f32.mrf.mxu0 }
 0x29c   : > { %v1568_v51 = vadd.f32 %v2363_v45, %v2251_v42  ;;  %v1845_v61 = vmax.f32 %v1813_v50, 0.0 }
 0x29d   : > { %v2253_v53 = vpop.f32.mrf.mxu1  ;;  %v2365_v60 = vpop.f32.mrf.mxu0 }
 0x29e   : > { %v2254_v0 = vadd.f32 %v2253_v53, %v2252_v46  ;;  %v2366_v54 = vadd.f32 %v2365_v60, %v2364_v47  ;;  %1877 = vst [vmem:[%s3253_s10 + $0x88] sm:$0xff] %v1845_v61  ;;  %v1814_v59 = vadd.f32 %v3249_v17, %v1568_v51 }
 0x29f   : > { %v2255_v55 = vpop.f32.mrf.mxu1  ;;  %v2367_v58 = vpop.f32.mrf.mxu0 }
 0x2a0   : > { %v1571_v1 = vadd.f32 %v2366_v54, %v2254_v0  ;;  %v1846_v4 = vmax.f32 %v1814_v59, 0.0 }
 0x2a1   : > { %v2256_v2 = vpop.f32.mrf.mxu1  ;;  %v2368_v3 = vpop.f32.mrf.mxu0 }
 0x2a2   : > { %v2257_v56 = vadd.f32 %v2256_v2, %v2255_v55  ;;  %v2369_v62 = vadd.f32 %v2368_v3, %v2367_v58  ;;  %1878 = vst [vmem:[%s3253_s10 + $0x90] sm:$0xff] %v1846_v4  ;;  %v1815_v63 = vadd.f32 %v3249_v17, %v1571_v1 }
 0x2a3   : > { %v2258_v5 = vpop.f32.mrf.mxu1  ;;  %v2370_v57 = vpop.f32.mrf.mxu0 }
 0x2a4   : > { %v1576_v6 = vadd.f32 %v2369_v62, %v2257_v56  ;;  %v1847_v9 = vmax.f32 %v1815_v63, 0.0 }
 0x2a5   : > { %v2259_v7 = vpop.f32.mrf.mxu1  ;;  %v2371_v8 = vpop.f32.mrf.mxu0 }
 0x2a6   : > { %v2260_v10 = vadd.f32 %v2259_v7, %v2258_v5  ;;  %v2372_v11 = vadd.f32 %v2371_v8, %v2370_v57  ;;  %1879 = vst [vmem:[%s3253_s10 + $0x98] sm:$0xff] %v1847_v9  ;;  %v1816_v14 = vadd.f32 %v3249_v17, %v1576_v6 }
 0x2a7   : > { %v2261_v12 = vpop.f32.mrf.mxu1  ;;  %v2373_v13 = vpop.f32.mrf.mxu0 }
 0x2a8   : > { %v1579_v15 = vadd.f32 %v2372_v11, %v2260_v10  ;;  %v1848_v19 = vmax.f32 %v1816_v14, 0.0 }
 0x2a9   : > { %v2262_v16 = vpop.f32.mrf.mxu1  ;;  %v2374_v18 = vpop.f32.mrf.mxu0 }
 0x2aa   : > { %v2263_v20 = vadd.f32 %v2262_v16, %v2261_v12  ;;  %v2375_v21 = vadd.f32 %v2374_v18, %v2373_v13  ;;  %1880 = vst [vmem:[%s3253_s10 + $0xa0] sm:$0xff] %v1848_v19  ;;  %v1817_v24 = vadd.f32 %v3249_v17, %v1579_v15 }
 0x2ab   : > { %v2264_v22 = vpop.f32.mrf.mxu1  ;;  %v2376_v23 = vpop.f32.mrf.mxu0 }
 0x2ac   : > { %v1584_v25 = vadd.f32 %v2375_v21, %v2263_v20  ;;  %v1849_v28 = vmax.f32 %v1817_v24, 0.0 }
 0x2ad   : > { %v2265_v26 = vpop.f32.mrf.mxu1  ;;  %v2377_v27 = vpop.f32.mrf.mxu0 }
 0x2ae   : > { %v2266_v29 = vadd.f32 %v2265_v26, %v2264_v22  ;;  %v2378_v30 = vadd.f32 %v2377_v27, %v2376_v23  ;;  %1881 = vst [vmem:[%s3253_s10 + $0xa8] sm:$0xff] %v1849_v28  ;;  %v1818_v33 = vadd.f32 %v3249_v17, %v1584_v25 }
 0x2af   : > { %v2267_v31 = vpop.f32.mrf.mxu1  ;;  %v2379_v32 = vpop.f32.mrf.mxu0 }
 0x2b0   : > { %v1587_v34 = vadd.f32 %v2378_v30, %v2266_v29  ;;  %v1850_v37 = vmax.f32 %v1818_v33, 0.0 }
 0x2b1   : > { %v2268_v35 = vpop.f32.mrf.mxu1  ;;  %v2380_v36 = vpop.f32.mrf.mxu0 }
 0x2b2   : > { %v2269_v38 = vadd.f32 %v2268_v35, %v2267_v31  ;;  %v2381_v39 = vadd.f32 %v2380_v36, %v2379_v32  ;;  %1882 = vst [vmem:[%s3253_s10 + $0xb0] sm:$0xff] %v1850_v37  ;;  %v1819_v52 = vadd.f32 %v3249_v17, %v1587_v34 }
 0x2b3   : > { %v2270_v40 = vpop.f32.mrf.mxu1  ;;  %v2382_v41 = vpop.f32.mrf.mxu0 }
 0x2b4   : > { %v1592_v44 = vadd.f32 %v2381_v39, %v2269_v38  ;;  %v1851_v43 = vmax.f32 %v1819_v52, 0.0 }
 0x2b5   : > { %v2271_v48 = vpop.f32.mrf.mxu1  ;;  %v2383_v49 = vpop.f32.mrf.mxu0 }
 0x2b6   : > { %v2272_v42 = vadd.f32 %v2271_v48, %v2270_v40  ;;  %v2384_v45 = vadd.f32 %v2383_v49, %v2382_v41  ;;  %1883 = vst [vmem:[%s3253_s10 + $0xb8] sm:$0xff] %v1851_v43  ;;  %v1820_v50 = vadd.f32 %v3249_v17, %v1592_v44 }
 0x2b7   : > { %v2273_v46 = vpop.f32.mrf.mxu1  ;;  %v2385_v47 = vpop.f32.mrf.mxu0 }
 0x2b8   : > { %v1595_v51 = vadd.f32 %v2384_v45, %v2272_v42  ;;  %v1852_v61 = vmax.f32 %v1820_v50, 0.0 }
 0x2b9   : > { %v2274_v53 = vpop.f32.mrf.mxu1  ;;  %v2386_v60 = vpop.f32.mrf.mxu0 }
 0x2ba   : > { %v2275_v0 = vadd.f32 %v2274_v53, %v2273_v46  ;;  %v2387_v54 = vadd.f32 %v2386_v60, %v2385_v47  ;;  %1884 = vst [vmem:[%s3253_s10 + $0xc0] sm:$0xff] %v1852_v61  ;;  %v1821_v59 = vadd.f32 %v3249_v17, %v1595_v51 }
 0x2bb   : > { %v2276_v55 = vpop.f32.mrf.mxu1  ;;  %v2388_v58 = vpop.f32.mrf.mxu0 }
 0x2bc   : > { %v1600_v1 = vadd.f32 %v2387_v54, %v2275_v0  ;;  %v1853_v4 = vmax.f32 %v1821_v59, 0.0 }
 0x2bd   : > { %v2277_v2 = vpop.f32.mrf.mxu1  ;;  %v2389_v3 = vpop.f32.mrf.mxu0 }
 0x2be   : > { %v2278_v56 = vadd.f32 %v2277_v2, %v2276_v55  ;;  %v2390_v62 = vadd.f32 %v2389_v3, %v2388_v58  ;;  %1885 = vst [vmem:[%s3253_s10 + $0xc8] sm:$0xff] %v1853_v4  ;;  %v1822_v63 = vadd.f32 %v3249_v17, %v1600_v1 }
 0x2bf   : > { %v2279_v5 = vpop.f32.mrf.mxu1  ;;  %v2391_v57 = vpop.f32.mrf.mxu0 }
 0x2c0   : > { %v1603_v6 = vadd.f32 %v2390_v62, %v2278_v56  ;;  %v1854_v9 = vmax.f32 %v1822_v63, 0.0 }
 0x2c1   : > { %v2280_v7 = vpop.f32.mrf.mxu1  ;;  %v2392_v8 = vpop.f32.mrf.mxu0 }
 0x2c2   : > { %v2281_v10 = vadd.f32 %v2280_v7, %v2279_v5  ;;  %v2393_v11 = vadd.f32 %v2392_v8, %v2391_v57  ;;  %1886 = vst [vmem:[%s3253_s10 + $0xd0] sm:$0xff] %v1854_v9  ;;  %v1823_v14 = vadd.f32 %v3249_v17, %v1603_v6 }
 0x2c3   : > { %v2282_v12 = vpop.f32.mrf.mxu1  ;;  %v2394_v13 = vpop.f32.mrf.mxu0 }
 0x2c4   : > { %v1608_v15 = vadd.f32 %v2393_v11, %v2281_v10  ;;  %v1855_v19 = vmax.f32 %v1823_v14, 0.0 }
 0x2c5   : > { %v2283_v16 = vpop.f32.mrf.mxu1  ;;  %v2395_v18 = vpop.f32.mrf.mxu0 }
 0x2c6   : > { %v2284_v20 = vadd.f32 %v2283_v16, %v2282_v12  ;;  %v2396_v21 = vadd.f32 %v2395_v18, %v2394_v13  ;;  %1887 = vst [vmem:[%s3253_s10 + $0xd8] sm:$0xff] %v1855_v19  ;;  %v1824_v24 = vadd.f32 %v3249_v17, %v1608_v15 }
 0x2c7   : > { %v2285_v22 = vpop.f32.mrf.mxu1  ;;  %v2397_v23 = vpop.f32.mrf.mxu0 }
 0x2c8   : > { %v1611_v25 = vadd.f32 %v2396_v21, %v2284_v20  ;;  %v1856_v28 = vmax.f32 %v1824_v24, 0.0 }
 0x2c9   : > { %v2286_v26 = vpop.f32.mrf.mxu1  ;;  %v2398_v27 = vpop.f32.mrf.mxu0 }
 0x2ca   : > { %v2287_v29 = vadd.f32 %v2286_v26, %v2285_v22  ;;  %v2399_v30 = vadd.f32 %v2398_v27, %v2397_v23  ;;  %1888 = vst [vmem:[%s3253_s10 + $0xe0] sm:$0xff] %v1856_v28  ;;  %v1825_v33 = vadd.f32 %v3249_v17, %v1611_v25 }
 0x2cb   : > { %v2288_v31 = vpop.f32.mrf.mxu1  ;;  %v2400_v32 = vpop.f32.mrf.mxu0 }
 0x2cc   : > { %v1616_v34 = vadd.f32 %v2399_v30, %v2287_v29  ;;  %v1857_v37 = vmax.f32 %v1825_v33, 0.0 }
 0x2cd   : > { %v2289_v35 = vpop.f32.mrf.mxu1  ;;  %v2401_v36 = vpop.f32.mrf.mxu0 }
 0x2ce   : > { %v2290_v38 = vadd.f32 %v2289_v35, %v2288_v31  ;;  %v2402_v39 = vadd.f32 %v2401_v36, %v2400_v32  ;;  %1889 = vst [vmem:[%s3253_s10 + $0xe8] sm:$0xff] %v1857_v37  ;;  %v1826_v40 = vadd.f32 %v3249_v17, %v1616_v34 }
 0x2d0   : > { %v1619_v41 = vadd.f32 %v2402_v39, %v2290_v38  ;;  %v1858_v52 = vmax.f32 %v1826_v40, 0.0 }
 0x2d2   : > { %1890 = vst [vmem:[%s3253_s10 + $0xf0] sm:$0xff] %v1858_v52  ;;  %v1827_v44 = vadd.f32 %v3249_v17, %v1619_v41 }
 0x2d4   : > { %v1859_v48 = vmax.f32 %v1827_v44, 0.0 }
 0x2d6   : > { %1891 = vst [vmem:[%s3253_s10 + $0xf8] sm:$0xff] %v1859_v48 }
 0x2d7   : > { %2818 = shalt.err (!%p2815_p5)
}
 0x2d8   : > { %s2819_s11 = scalar_lea.hbm %s3322_s29, 4096  ;;  %s2823_s25 = scalar_lea.hbm %s3377_s4, 8192 }
 0x2d9   : > { %p2820_p10 = scmp.ne.s32.totalorder %s3322_s29, %s2819_s11  ;;  %p2824_p6 = scmp.lt.s32.totalorder %s3322_s29, %s3377_s4 }
 0x2da   : > { %p2825_p12 = scmp.lt.s32.totalorder %s2823_s25, %s2819_s11 }
 0x2db   : > { %p2821_p1 = pnand %p2820_p10, %p3021_p7 }
 0x2dc   : > { %p2826_p3 = por %p2825_p12, %p2824_p6 }
 0x2dd   : > { %p2822_p4 = pneg %p2821_p1 }
 0x2df   : > { %p2827_p8 = pnand %p2826_p3, %p2822_p4 }
 0x2e1   : > { %2830 = shalt.err (!%p2827_p8)
}
 0x2e2   : > { %s2899_s12 = smov 128   ;;  %s2900_s13 = smov 8  }
 0x2e3   : > { %2509 = dma.vmem_to_hbm [thread:$0]  (%p3021_p7), %s3324_s24, 4096, %s3322_s29, %s1893_s6, %s2899_s12, %s2899_s12, %s2900_s13  }
 0x2e4 PF: > { %s1921_s22 = sand.u32 1, %s2869_s15   ;;  %p3427_p9 = scmp.ne.s32.totalorder %s3392_s26, 0 }
 0x2e5   : > { %p3428_p11 = scmp.ge.s32.totalorder %s2889_s20, 2  ;;  %s1922_s5 = scalar_lea.sflag [#allocation4], %s1921_s22 }
 0x2e7   : > { %p2523_p2 = pnand %p3428_p11, %p3427_p9 }
 0x2e9   : > { %p2524_p13 = pneg %p2523_p2 }
 0x2eb   : > { %2864 = dma.done.wait (%p2524_p13), %s1922_s5, 4096  }
 0x2ec   : > { %2866 = vsyncadd (%p2524_p13), %s1922_s5, 4294963200  ;;  %s21_s20 = sadd.s32 1, %s2889_s20   ;;  %s3429_s15 = smov %s2873_s16 }
 0x2ed   : > { %p18_p0 = scmp.ge.s32.totalorder %s21_s20, 4   ;;  %s3430_s16 = smov %s2877_s17 }
 0x2ee   : > { %s3431_s17 = smov %s3030_s7  ;;  %s3432_s18 = smov %s2885_s19 }
 0x2ef   : > { %s3433_s19 = smov %s3435_s21  ;;  %20 = sbr.rel (!%p18_p0) target bundleno = 7 (0x7), region = 98 }
 0x2f4   :  { %1927 = vsyncpa [#allocation3], 1 }
 0x2f5   :  { %1929 = vsyncpa [#allocation3 + $0x1], 1 }
 0x2f6   :  { %1930 = vsyncpa [#allocation6], 1 }
 0x2f7   :  { %1931 = vsyncpa [#allocation4], 1 }
 0x2f8   :  { %1933 = vsyncpa [#allocation4 + $0x1], 1 }

</bundles_post_ra>
